<compile_context>
chip_gen: v7x
topology: tpu7x:2x2x1
jax: 0.10.0
libtpu: 0.0.40
codegen_flags: <defaults>
</compile_context>

<pallas_src>
import functools
import math

import jax
import jax.numpy as jnp
from jax.experimental import pallas as pl
from jax.experimental.pallas import tpu as pltpu

EPS = 1e-5
_MIB = 1024 * 1024

_TARGET_BLOCK_BYTES = 2 * _MIB     # ~2 MiB input blocks saturate HBM streaming
_MIN_BLOCK_BYTES = 512 * 1024      # below this the ~0.35us/step overhead dominates
_MAX_LANE_TILE = 8192


def _mag_layernorm_kernel(x_ref, o_ref, *, eps):
    # Block: (2, d, LT) float32; plane 0 = real, plane 1 = imag.  Rows live on
    # the 128-lane axis (dense vst stores); the normalized feature axis d lives
    # on sublanes, so the statistics are cheap sublane reductions.
    xr = x_ref[0, :, :]                          # (d, LT)
    xi = x_ref[1, :, :]

    sq = xr * xr + xi * xi                       # |x|^2
    nonzero = sq > 0.0
    # One EUP rsqrt gives both |x| and 1/|x| (no full-width divide on the VALU).
    inv_mag = jax.lax.rsqrt(jnp.where(nonzero, sq, 1.0))
    mag = sq * inv_mag                           # |x|, exactly 0 where x == 0

    # Population statistics over the feature axis: var = E[mag^2] - mean^2,
    # reusing sq == mag^2 (clamp guards tiny negative rounding).
    mean = jnp.mean(mag, axis=0, keepdims=True)              # (1, LT)
    mean_sq = jnp.mean(sq, axis=0, keepdims=True)            # E[|x|^2]
    var = jnp.maximum(mean_sq - mean * mean, 0.0)
    inv_std = pl.reciprocal(jnp.sqrt(var) + eps)             # (1, LT), exact & tiny

    nmag = (mag - mean) * inv_std                # (d, LT)

    # polar(nmag, angle(x)) = x * (nmag / |x|);  angle(0) == 0 -> (nmag, 0).
    factor = nmag * inv_mag
    o_ref[0, :, :] = jnp.where(nonzero, xr * factor, nmag)
    o_ref[1, :, :] = xi * factor                 # xi == 0 wherever sq == 0


def _vmem_capacity_bytes():
    try:
        return int(pltpu.get_tpu_info().vmem_capacity_bytes)
    except Exception:
        return 64 * _MIB   # conservative fallback (v7x per-TensorCore figure)


def _pick_lane_tile(rows, d, vmem_cap):
    """Pick the lane (row) tile: ~2 MiB blocks, >=8 grid steps when cheap."""
    d_sub = -(-d // 8) * 8                        # sublane padding in VMEM
    bytes_per_lane = 8 * d_sub                    # 2 planes * 4 B per lane column
    lt = (_TARGET_BLOCK_BYTES // bytes_per_lane) // 128 * 128
    lt = max(128, min(_MAX_LANE_TILE, lt))
    # Prefer >= 8 grid steps (pipeline depth + megacore sharding on v7x) as
    # long as blocks stay >= ~512 KiB.
    lt_floor = max(128, (_MIN_BLOCK_BYTES // bytes_per_lane) // 128 * 128)
    lt_8way = (-(-rows // 8) + 127) // 128 * 128
    if lt_8way >= lt_floor:
        lt = min(lt, lt_8way)
    # 2 input + 2 output block buffers must fit in VMEM with headroom
    # (64 MiB/TC on v7x vs 128 MiB on v5e/v6e).
    budget = min(24 * _MIB, max(8 * _MIB, vmem_cap // 2 - 8 * _MIB))
    while lt > 128 and 4 * bytes_per_lane * lt > budget:
        lt -= 128
    if 4 * bytes_per_lane * lt > budget:
        # TODO(synk): add a split-D (two-pass statistics) path for very wide d.
        raise NotImplementedError(
            f"MagnitudeLayerNorm kernel: feature dim d={d} too wide for a "
            f"single-pass block within the VMEM budget ({budget} bytes)")
    return rows if rows <= lt else lt


def magnitude_layernorm_planar_t(xf_t, *, eps=EPS, lane_tile=None):
    """Core kernel on lane-dense planar input.

    xf_t: float32 (2, d, rows) with xf_t[0]=real, xf_t[1]=imag; the
    layer-norm runs over the d axis. Returns the same shape/dtype.
    """
    two, d, rows = xf_t.shape
    assert two == 2
    if xf_t.dtype != jnp.float32:
        xf_t = xf_t.astype(jnp.float32)

    vmem_cap = _vmem_capacity_bytes()
    if lane_tile is None:
        lt = _pick_lane_tile(rows, d, vmem_cap)
    else:
        lt = int(lane_tile)
        lt = rows if lt >= rows else max(128, (lt // 128) * 128)

    d_sub = -(-d // 8) * 8
    block_bytes = 8 * d_sub * lt                  # one (2, d, LT) buffer, padded
    vmem_limit = int(min(vmem_cap // 2, max(16 * _MIB, 4 * block_bytes + 4 * _MIB)))

    n_blocks = pl.cdiv(rows, lt)                  # ragged tail masked by pipeline
    spec = pl.BlockSpec((2, d, lt), lambda i: (0, 0, i))

    return pl.pallas_call(
        functools.partial(_mag_layernorm_kernel, eps=eps),
        out_shape=jax.ShapeDtypeStruct((2, d, rows), jnp.float32),
        grid_spec=pltpu.PrefetchScalarGridSpec(
            num_scalar_prefetch=0,
            grid=(n_blocks,),
            in_specs=[spec],
            out_specs=spec,
        ),
        compiler_params=pltpu.CompilerParams(
            dimension_semantics=("parallel",),
            vmem_limit_bytes=vmem_limit,
        ),
    )(xf_t)


def magnitude_layernorm_planar(xf, *, eps=EPS, lane_tile=None):
    """xf: float32 (2, rows, d) planar (real, imag). Returns the same shape.

    Note: the zero-extra-copy layout is (2, d, rows); callers that can hold
    that layout should use magnitude_layernorm_planar_t directly.
    """
    out_t = magnitude_layernorm_planar_t(jnp.swapaxes(xf, 1, 2),
                                         eps=eps, lane_tile=lane_tile)
    return jnp.swapaxes(out_t, 1, 2)


def magnitude_layernorm(x, *, eps=EPS, lane_tile=None):
    """Complex magnitude layer-norm over the last axis (complex64 in / out)."""
    if x.dtype != jnp.complex64:
        x = x.astype(jnp.complex64)
    orig_shape = x.shape
    d = orig_shape[-1]
    rows = int(math.prod(orig_shape[:-1])) if len(orig_shape) > 1 else 1
    xc = x.reshape(rows, d)

    # One fused conversion pass: complex64 -> lane-dense planar (2, d, rows).
    # TODO(synk): unavoidable while Mosaic lacks complex-typed refs and
    # lax.bitcast_convert_type rejects complex dtypes.
    xf_t = jnp.swapaxes(jnp.stack([jnp.real(xc), jnp.imag(xc)], axis=0), 1, 2)

    out_t = magnitude_layernorm_planar_t(xf_t, eps=eps, lane_tile=lane_tile)

    # One fused conversion pass back to complex64.
    out = jnp.swapaxes(jax.lax.complex(out_t[0], out_t[1]), 0, 1)
    return out.reshape(orig_shape)


def _reference(x, eps=EPS):
    mag = jnp.abs(x)
    mean = jnp.mean(mag, axis=-1, keepdims=True)
    std = jnp.sqrt(jnp.mean((mag - mean) ** 2, axis=-1, keepdims=True))
    nmag = (mag - mean) / (std + eps)
    phase = jnp.angle(x)
    return (nmag * jnp.cos(phase)) + 1j * (nmag * jnp.sin(phase))


if __name__ == "__main__":
    key = jax.random.PRNGKey(0)
    kr, ki = jax.random.split(key)

    mln = jax.jit(magnitude_layernorm)

    # Primary shape: NCHW-like complex input, normalized over the last dim
    # (rows = 2*4*16 = 128 sits exactly on one 128-lane tile).
    shape = (2, 4, 16, 16)
    x = jax.lax.complex(
        jax.random.normal(kr, shape, dtype=jnp.float32),
        jax.random.normal(ki, shape, dtype=jnp.float32),
    )
    out = jax.block_until_ready(mln(x))
    ref = _reference(x)
    assert out.shape == shape and out.dtype == jnp.complex64
    assert jnp.allclose(out, ref, atol=1e-4, rtol=1e-4)

    # rows < 128: a single full-extent lane block (no padding anywhere).
    kr2, ki2 = jax.random.split(ki)
    shape2 = (3, 5, 16)
    x2 = jax.lax.complex(
        jax.random.normal(kr2, shape2, dtype=jnp.float32),
        jax.random.normal(ki2, shape2, dtype=jnp.float32),
    )
    out2 = jax.block_until_ready(mln(x2))
    ref2 = _reference(x2)
    assert out2.shape == shape2 and out2.dtype == jnp.complex64
    assert jnp.allclose(out2, ref2, atol=1e-4, rtol=1e-4)

    # Ragged lane tail: rows = 200 with a forced 128-lane tile — no jnp.pad /
    # output slice around the kernel; the pipeline masks the edge block.
    kr3, ki3 = jax.random.split(ki2)
    shape3 = (5, 40, 16)
    x3 = jax.lax.complex(
        jax.random.normal(kr3, shape3, dtype=jnp.float32),
        jax.random.normal(ki3, shape3, dtype=jnp.float32),
    )
    out3 = jax.block_until_ready(
        jax.jit(lambda v: magnitude_layernorm(v, lane_tile=128))(x3))
    ref3 = _reference(x3)
    assert out3.shape == shape3 and out3.dtype == jnp.complex64
    assert jnp.allclose(out3, ref3, atol=1e-4, rtol=1e-4)

    print("KERNEL_OK")
</pallas_src>

<mosaic_0001>
module attributes {stable_mosaic.version = 11 : i64} {
  func.func @_mag_layernorm_kernel(%arg0: i32, %arg1: memref<2x16x128xf32, #tpu.memory_space<vmem>>, %arg2: memref<2x16x128xf32, #tpu.memory_space<vmem>>) attributes {dimension_semantics = [#tpu.dimension_semantics<parallel>], iteration_bounds = array<i64: 1>, scalar_prefetch = 0 : i64, scratch_operands = 0 : i64, tpu.core_type = #tpu.core_type<tc>, window_params = [{transform_indices = @transform_0, window_bounds = array<i64: 2, 16, 128>}, {transform_indices = @transform_1, window_bounds = array<i64: 2, 16, 128>}]} {
    %c0 = arith.constant 0 : index
    %c0_0 = arith.constant 0 : index
    %c0_1 = arith.constant 0 : index
    %0 = vector.load %arg1[%c0, %c0_0, %c0_1] : memref<2x16x128xf32, #tpu.memory_space<vmem>>, vector<1x16x128xf32>
    %1 = vector.shape_cast %0 : vector<1x16x128xf32> to vector<16x128xf32>
    %c1 = arith.constant 1 : index
    %c0_2 = arith.constant 0 : index
    %c0_3 = arith.constant 0 : index
    %2 = vector.load %arg1[%c1, %c0_2, %c0_3] : memref<2x16x128xf32, #tpu.memory_space<vmem>>, vector<1x16x128xf32>
    %3 = vector.shape_cast %2 : vector<1x16x128xf32> to vector<16x128xf32>
    %4 = arith.mulf %1, %1 : vector<16x128xf32>
    %5 = arith.mulf %3, %3 : vector<16x128xf32>
    %6 = arith.addf %4, %5 : vector<16x128xf32>
    %cst = arith.constant 0.000000e+00 : f32
    %7 = vector.broadcast %cst : f32 to vector<16x128xf32>
    %8 = arith.cmpf ogt, %6, %7 : vector<16x128xf32>
    %cst_4 = arith.constant 1.000000e+00 : f32
    %9 = vector.broadcast %cst_4 : f32 to vector<16x128xf32>
    %10 = arith.select %8, %6, %9 : vector<16x128xi1>, vector<16x128xf32>
    %11 = math.rsqrt %10 : vector<16x128xf32>
    %12 = arith.mulf %6, %11 : vector<16x128xf32>
    %cst_5 = arith.constant dense<0.000000e+00> : vector<128xf32>
    %13 = vector.multi_reduction <add>, %12, %cst_5 [0] : vector<16x128xf32> to vector<128xf32>
    %14 = vector.shape_cast %13 : vector<128xf32> to vector<1x128xf32>
    %cst_6 = arith.constant 1.600000e+01 : f32
    %15 = vector.broadcast %cst_6 : f32 to vector<1x128xf32>
    %16 = arith.divf %14, %15 : vector<1x128xf32>
    %cst_7 = arith.constant dense<0.000000e+00> : vector<128xf32>
    %17 = vector.multi_reduction <add>, %6, %cst_7 [0] : vector<16x128xf32> to vector<128xf32>
    %18 = vector.shape_cast %17 : vector<128xf32> to vector<1x128xf32>
    %cst_8 = arith.constant 1.600000e+01 : f32
    %19 = vector.broadcast %cst_8 : f32 to vector<1x128xf32>
    %20 = arith.divf %18, %19 : vector<1x128xf32>
    %21 = arith.mulf %16, %16 : vector<1x128xf32>
    %22 = arith.subf %20, %21 : vector<1x128xf32>
    %cst_9 = arith.constant 0.000000e+00 : f32
    %23 = vector.broadcast %cst_9 : f32 to vector<1x128xf32>
    %24 = arith.maximumf %22, %23 : vector<1x128xf32>
    %25 = math.sqrt %24 : vector<1x128xf32>
    %cst_10 = arith.constant 9.99999974E-6 : f32
    %26 = vector.broadcast %cst_10 : f32 to vector<1x128xf32>
    %27 = arith.addf %25, %26 : vector<1x128xf32>
    %28 = tpu.reciprocal %27 : vector<1x128xf32> -> vector<1x128xf32>
    %29 = vector.broadcast %16 : vector<1x128xf32> to vector<16x128xf32>
    %30 = arith.subf %12, %29 : vector<16x128xf32>
    %31 = vector.broadcast %28 : vector<1x128xf32> to vector<16x128xf32>
    %32 = arith.mulf %30, %31 : vector<16x128xf32>
    %33 = arith.mulf %32, %11 : vector<16x128xf32>
    %34 = arith.mulf %1, %33 : vector<16x128xf32>
    %35 = arith.select %8, %34, %32 : vector<16x128xi1>, vector<16x128xf32>
    %c0_11 = arith.constant 0 : index
    %c0_12 = arith.constant 0 : index
    %c0_13 = arith.constant 0 : index
    %36 = vector.load %arg2[%c0_11, %c0_12, %c0_13] : memref<2x16x128xf32, #tpu.memory_space<vmem>>, vector<1x16x128xf32>
    %37 = vector.shape_cast %36 : vector<1x16x128xf32> to vector<16x128xf32>
    %38 = vector.shape_cast %35 : vector<16x128xf32> to vector<1x16x128xf32>
    tpu.vector_store %arg2[%c0_11, %c0_12, %c0_13], %38 {strides = array<i32>} : memref<2x16x128xf32, #tpu.memory_space<vmem>>, vector<1x16x128xf32>,
    %39 = arith.mulf %3, %33 : vector<16x128xf32>
    %c1_14 = arith.constant 1 : index
    %c0_15 = arith.constant 0 : index
    %c0_16 = arith.constant 0 : index
    %40 = vector.load %arg2[%c1_14, %c0_15, %c0_16] : memref<2x16x128xf32, #tpu.memory_space<vmem>>, vector<1x16x128xf32>
    %41 = vector.shape_cast %40 : vector<1x16x128xf32> to vector<16x128xf32>
    %42 = vector.shape_cast %39 : vector<16x128xf32> to vector<1x16x128xf32>
    tpu.vector_store %arg2[%c1_14, %c0_15, %c0_16], %42 {strides = array<i32>} : memref<2x16x128xf32, #tpu.memory_space<vmem>>, vector<1x16x128xf32>,
    return
  }
  func.func @transform_0(%arg0: i32) -> (i32, i32, i32) {
    %c0_i32 = arith.constant 0 : i32
    %c0_i32_0 = arith.constant 0 : i32
    %c0_i32_1 = arith.constant 0 : i32
    return %c0_i32, %c0_i32_0, %arg0 : i32, i32, i32
  }
  func.func @transform_1(%arg0: i32) -> (i32, i32, i32) {
    %c0_i32 = arith.constant 0 : i32
    %c0_i32_0 = arith.constant 0 : i32
    %c0_i32_1 = arith.constant 0 : i32
    return %c0_i32, %c0_i32_0, %arg0 : i32, i32, i32
  }
}

</mosaic_0001>

<bundles_post_ra>
// kernel: custom-call
= control target key start
LH: loop header
LB: loop body
LE: loop exit
PB: predicated region body
PF: predicated region fallthrough
CT: control target
= control target key end

     0   :  { %2 = vsyncpa [#allocation0], 0  ;;  %s61_s0 = inlined_call_operand.hbm [shape: c64[2,4,16,16], index: 0, kind: input, shape index: {}]   ;;  %s62_s1 = inlined_call_operand.vmem [shape: f32[2,4,16,16], index: 1, kind: output, shape index: {}]  }
   0x1   :  { %s3_s8 = sshll.u32 %s62_s1, 4  ;;  %s9_s11 = scalar_lea.hbm %s61_s0, 2048  ;;  %s4_s8 = int_to_ptr.vmem [resolvable:$true] %s3_s8 }
   0x2   :  { %p10_p0 = scmp.ne.s32.totalorder %s61_s0, %s9_s11  ;;  %s11_s16 = scalar_lea.hbm %s61_s0, 4096 }
   0x3   :  { %p12_p1 = scmp.lt.u32.totalorder %s11_s16, %s9_s11  ;;  %p13_p2 = scmp.lt.u32.totalorder %s9_s11, %s61_s0 }
   0x5   :  { %p14_p3 = por %p13_p2, %p12_p1 }
   0x7   :  { %p15_p4 = pnand %p14_p3, %p10_p0 }
   0x9   :  { %18 = shalt.err (!%p15_p4)  }
   0xa   :  { %s19_s1 = scalar_lea.vmem %s4_s8, 2048  ;;  %p24_p6 = scmp.lt.s32.totalorder %s4_s8, %s4_s8 }
   0xb   :  { %p20_p5 = scmp.ne.s32.totalorder %s4_s8, %s19_s1  ;;  %p25_p7 = scmp.lt.s32.totalorder %s19_s1, %s19_s1 }
   0xd   :  { %p26_p8 = por %p25_p7, %p24_p6 }
   0xf   :  { %p27_p9 = pnand %p26_p8, %p20_p5 }
  0x11   :  { %30 = shalt.err (!%p27_p9)  }
  0x12   :  { %6 = dma.hbm_to_vmem [thread:$0]  %s61_s0, 2048, %s4_s8, [#allocation0] }
  0x13   :  { %31 = dma.done.wait [#allocation0], 2048  }
  0x14   :  { %32 = vsyncadd [#allocation0], 4294965248 }
  0x15   :  { %8 = vsyncpa [#allocation0], 1 }

// kernel: custom-call.1
= control target key start
LH: loop header
LB: loop body
LE: loop exit
PB: predicated region body
PF: predicated region fallthrough
CT: control target
= control target key end

     0   :  { %s59_s0 = inlined_call_operand.hbm [shape: c64[2,4,16,16], index: 0, kind: input, shape index: {}]   ;;  %s60_s1 = inlined_call_operand.vmem [shape: f32[2,4,16,16], index: 1, kind: output, shape index: {}]  }
   0x1   :  { %s2_s8 = scalar_lea.hbm %s59_s0, 2048 }
   0x2   :  { %3 = vsyncpa [#allocation0], 0  ;;  %s4_s11 = sshll.u32 %s60_s1, 4  ;;  %s34_s14 = scalar_lea.hbm %s59_s0, 4096  ;;  %s5_s11 = int_to_ptr.vmem [resolvable:$true] %s4_s11 }
   0x3   :  { %p11_p0 = scmp.ne.s32.totalorder %s2_s8, %s34_s14  ;;  %p13_p1 = scmp.lt.u32.totalorder %s2_s8, %s59_s0 }
   0x4   :  { %p14_p2 = scmp.lt.u32.totalorder %s34_s14, %s34_s14  ;;  %p16_p4 = scmp.lt.u32.totalorder %s34_s14, %s2_s8 }
   0x6   :  { %p15_p3 = por %p14_p2, %p13_p1 }
   0x8   :  { %p17_p5 = por %p16_p4, %p15_p3 }
   0xa   :  { %p18_p6 = pnand %p17_p5, %p11_p0 }
   0xc   :  { %21 = shalt.err (!%p18_p6)  }
   0xd   :  { %s22_s17 = scalar_lea.vmem %s5_s11, 2048  ;;  %p27_p8 = scmp.lt.s32.totalorder %s5_s11, %s5_s11 }
   0xe   :  { %p23_p7 = scmp.ne.s32.totalorder %s5_s11, %s22_s17  ;;  %p28_p9 = scmp.lt.s32.totalorder %s22_s17, %s22_s17 }
  0x10   :  { %p29_p10 = por %p28_p9, %p27_p8 }
  0x12   :  { %p30_p11 = pnand %p29_p10, %p23_p7 }
  0x14   :  { %33 = shalt.err (!%p30_p11)  }
  0x15   :  { %7 = dma.hbm_to_vmem [thread:$0]  %s2_s8, 2048, %s5_s11, [#allocation0] }
  0x16   :  { %35 = dma.done.wait [#allocation0], 2048  }
  0x17   :  { %36 = vsyncadd [#allocation0], 4294965248 }
  0x18   :  { %9 = vsyncpa [#allocation0], 1 }

// kernel: custom-call.2
= control target key start
LH: loop header
LB: loop body
LE: loop exit
PB: predicated region body
PF: predicated region fallthrough
CT: control target
= control target key end

     0   :  { %s126_s0 = inlined_call_operand.vmem [shape: f32[2,4,16,16], index: 0, kind: input, shape index: {}]   ;;  %s127_s1 = inlined_call_operand.vmem [shape: f32[2,4,16,16], index: 1, kind: input, shape index: {}]   ;;  %s128_s2 = inlined_call_operand.hbm [shape: c64[2,4,16,16], index: 2, kind: output, shape index: {}]  }
   0x1   :  { %s87_s11 = scalar_lea.hbm %s128_s2, 2048 }
   0x2   :  { %4 = vsyncpa [#allocation0], 0  ;;  %s5_s14 = sshll.u32 %s126_s0, 4  ;;  %s6_s14 = int_to_ptr.vmem [resolvable:$true] %s5_s14 }
   0x3   :  { %s18_s15 = scalar_lea.vmem %s6_s14, 2048  ;;  %p23_p1 = scmp.lt.s32.totalorder %s6_s14, %s6_s14 }
   0x4   :  { %p19_p0 = scmp.ne.s32.totalorder %s6_s14, %s18_s15  ;;  %p24_p2 = scmp.lt.s32.totalorder %s18_s15, %s18_s15 }
   0x6   :  { %p25_p3 = por %p24_p2, %p23_p1 }
   0x8   :  { %p26_p4 = pnand %p25_p3, %p19_p0 }
   0xa   :  { %29 = shalt.err (!%p26_p4)  }
   0xb   :  { %p31_p5 = scmp.ne.s32.totalorder %s128_s2, %s87_s11  ;;  %s32_s0 = scalar_lea.hbm %s128_s2, 4096 }
   0xc   :  { %p33_p6 = scmp.lt.u32.totalorder %s32_s0, %s87_s11  ;;  %p34_p7 = scmp.lt.u32.totalorder %s87_s11, %s128_s2 }
   0xe   :  { %p35_p8 = por %p34_p7, %p33_p6 }
  0x10   :  { %p36_p9 = pnand %p35_p8, %p31_p5 }
  0x12   :  { %39 = shalt.err (!%p36_p9)  }
  0x13   :  { %8 = dma.vmem_to_hbm [thread:$0]  %s6_s14, 2048, %s128_s2, [#allocation0] }
  0x14   :  { %65 = dma.done.wait [#allocation0], 2048  }
  0x15   :  { %66 = vsyncadd [#allocation0], 4294965248 }
  0x16   :  { %10 = vsyncpa [#allocation0], 1 }
  0x17   :  { %11 = vsyncpa [#allocation1], 0  ;;  %s12_s28 = sshll.u32 %s127_s1, 4  ;;  %s13_s28 = int_to_ptr.vmem [resolvable:$true] %s12_s28 }
  0x18   :  { %s40_s29 = scalar_lea.vmem %s13_s28, 2048  ;;  %p45_p11 = scmp.lt.s32.totalorder %s13_s28, %s13_s28 }
  0x19   :  { %p41_p10 = scmp.ne.s32.totalorder %s13_s28, %s40_s29  ;;  %p46_p12 = scmp.lt.s32.totalorder %s40_s29, %s40_s29 }
  0x1b   :  { %p47_p13 = por %p46_p12, %p45_p11 }
  0x1d   :  { %p48_p0 = pnand %p47_p13, %p41_p10 }
  0x1f   :  { %51 = shalt.err (!%p48_p0)  }
  0x20   :  { %p53_p1 = scmp.ne.s32.totalorder %s87_s11, %s32_s0  ;;  %p56_p2 = scmp.lt.u32.totalorder %s32_s0, %s32_s0 }
  0x22   :  { %p57_p3 = por %p56_p2, %p34_p7 }
  0x24   :  { %p59_p4 = por %p57_p3, %p33_p6 }
  0x26   :  { %p60_p5 = pnand %p59_p4, %p53_p1 }
  0x28   :  { %63 = shalt.err (!%p60_p5)  }
  0x29   :  { %15 = dma.vmem_to_hbm [thread:$0]  %s13_s28, 2048, %s87_s11, [#allocation1] }
  0x2a   :  { %67 = dma.done.wait [#allocation1], 2048  }
  0x2b   :  { %68 = vsyncadd [#allocation1], 4294965248 }
  0x2c   :  { %17 = vsyncpa [#allocation1], 1 }

// kernel: magnitude_layernorm.1
= control target key start
LH: loop header
LB: loop body
LE: loop exit
PB: predicated region body
PF: predicated region fallthrough
CT: control target
= control target key end

     0   :  { %s127_s0 = inlined_call_operand.vmem [shape: f32[2,16,128], index: 0, kind: input, shape index: {}]   ;;  %s128_s1 = inlined_call_operand.vmem [shape: f32[2,16,128], index: 1, kind: output, shape index: {}]  }
   0x1   :  { %v8_v0 = vld [vmem:[%s127_s0] sm:$0xff]  ;;  %v9_v1 = vld [vmem:[%s127_s0 + $0x8] sm:$0xff]  ;;  %v77_v2 = vld [vmem:[%s127_s0 + $0x10] sm:$0xff] }
   0x2   :  { %v78_v3 = vld [vmem:[%s127_s0 + $0x18] sm:$0xff]  ;;  %v13_v4 = vmul.f32 %v8_v0, %v8_v0  ;;  %v14_v5 = vmul.f32 %v9_v1, %v9_v1  ;;  %v15_v6 = vmul.f32 %v77_v2, %v77_v2 }
   0x3   :  { %v16_v7 = vmul.f32 %v78_v3, %v78_v3 }
   0x4   :  { %v17_v8 = vadd.f32 %v15_v6, %v13_v4 }
   0x5   :  { %v18_v9 = vadd.f32 %v16_v7, %v14_v5 }
   0x6   :  { %vm19_vm0 = vcmp.gt.f32.partialorder %v17_v8, 0.0 }
   0x7   :  { %vm20_vm1 = vcmp.gt.f32.partialorder %v18_v9, 0.0  ;;  %v21_v10 = vsel %vm19_vm0, %v17_v8, 1.0  ;;  %v36_v12 = vadd.f32 %v18_v9, %v17_v8 }
   0x8   :  { %v22_v11 = vsel %vm20_vm1, %v18_v9, 1.0  ;;  %81 = vrsqrt.f32 %v21_v10 }
   0x9   :  { %83 = vrsqrt.f32 %v22_v11  ;;  %v37_v13 = vrot.slane %v36_v12, 4 }
   0xb   :  { %v38_v14 = vadd.f32 %v37_v13, %v36_v12 }
   0xd   :  { %v39_v19 = vrot.slane %v38_v14, 2 }
   0xf   :  { %v40_v22 = vadd.f32 %v39_v19, %v38_v14 }
  0x11   :  { %v41_v25 = vrot.slane %v40_v22, 1 }
  0x12   :  { %v82_v15 = vpop.eup %81 }
  0x13   :  { %v84_v16 = vpop.eup %83  ;;  %v25_v17 = vmul.f32 %v82_v15, %v17_v8  ;;  %v42_v28 = vadd.f32 %v41_v25, %v40_v22 }
  0x14   :  { %v26_v18 = vmul.f32 %v84_v16, %v18_v9 }
  0x15   :  { %v43_v31 = vmul.f32 0.0625, %v42_v28 }
  0x16   :  { %v27_v20 = vadd.f32 %v26_v18, %v25_v17 }
  0x18   :  { %v28_v21 = vrot.slane %v27_v20, 4 }
  0x1a   :  { %v29_v23 = vadd.f32 %v28_v21, %v27_v20 }
  0x1c   :  { %v30_v24 = vrot.slane %v29_v23, 2 }
  0x1e   :  { %v31_v26 = vadd.f32 %v30_v24, %v29_v23 }
  0x20   :  { %v32_v27 = vrot.slane %v31_v26, 1 }
  0x22   :  { %v33_v29 = vadd.f32 %v32_v27, %v31_v26 }
  0x24   :  { %v35_v30 = vmul.f32 0.0625, %v33_v29 }
  0x26   :  { %v44_v32 = vmul.f32 %v35_v30, %v35_v30  ;;  %v56_v41 = vsub.f32 %v25_v17, %v35_v30  ;;  %v57_v42 = vsub.f32 %v26_v18, %v35_v30 }
  0x28   :  { %v45_v33 = vsub.f32 %v43_v31, %v44_v32 }
  0x2a   :  { %v46_v34 = vmax.f32 %v45_v33, 0.0 }
  0x2c   :  { %85 = vrsqrt.f32 %v46_v34  ;;  %vm49_vm2 = vcmp.eq.f32.partialorder %v46_v34, inf  ;;  %v52_v36 = vand.u32 2147483648, %v46_v34  ;;  %vm51_vm3 = vcmp.eq.f32.partialorder %v46_v34, 0.0 }
  0x36   :  { %v86_v35 = vpop.eup %85 }
  0x37   :  { %v48_v37 = vmul.f32 %v86_v35, %v46_v34 }
  0x39   :  { %v50_v38 = vsel %vm49_vm2, %v46_v34, %v48_v37 }
  0x3a   :  { %v53_v39 = vsel %vm51_vm3, %v52_v36, %v50_v38 }
  0x3b   :  { %v54_v40 = vadd.f32 1e-05, %v53_v39 }
  0x3d   :  { %87 = vrcp.f32 %v54_v40 }
  0x47   :  { %v88_v43 = vpop.eup %87 }
  0x48   :  { %v58_v44 = vmul.f32 %v88_v43, %v56_v41  ;;  %v59_v45 = vmul.f32 %v88_v43, %v57_v42 }
  0x4a   :  { %v60_v46 = vmul.f32 %v82_v15, %v58_v44  ;;  %v61_v47 = vmul.f32 %v84_v16, %v59_v45 }
  0x4c   :  { %v62_v48 = vmul.f32 %v60_v46, %v8_v0  ;;  %v63_v49 = vmul.f32 %v61_v47, %v9_v1  ;;  %v68_v50 = vmul.f32 %v77_v2, %v60_v46  ;;  %v69_v51 = vmul.f32 %v78_v3, %v61_v47 }
  0x4e   :  { %v64_v52 = vsel %vm19_vm0, %v62_v48, %v58_v44  ;;  %v65_v53 = vsel %vm20_vm1, %v63_v49, %v59_v45  ;;  %79 = vst [vmem:[%s128_s1 + $0x10] sm:$0xff] %v68_v50  ;;  %80 = vst [vmem:[%s128_s1 + $0x18] sm:$0xff] %v69_v51 }
  0x4f   :  { %66 = vst [vmem:[%s128_s1] sm:$0xff] %v64_v52  ;;  %67 = vst [vmem:[%s128_s1 + $0x8] sm:$0xff] %v65_v53 }

</bundles_post_ra>
